<compile_context>
chip_gen: v5e
topology: v5e:2x2
jax: 0.10.0
libtpu: 0.0.40
codegen_flags: <defaults>
</compile_context>

<pallas_src>
import functools

import jax
import jax.numpy as jnp
from jax.experimental import pallas as pl
from jax.experimental.pallas import tpu as pltpu


def _round_up(a, m):
    return (a + m - 1) // m * m


def mlp_kernel(x_ref, w1_ref, b1_ref, w2_ref, b2_ref, o_ref, *, hc):
    xb = x_ref[...]                                  # bf16 [tb, Dp], lane-dense
    n_chunks = w1_ref.shape[1] // hc
    for c in range(n_chunks):                        # static unroll over hidden chunks
        sl = pl.ds(c * hc, hc)
        # linear1 chunk: bf16 MXU matmul, f32 accumulate
        h = jnp.dot(xb, w1_ref[:, sl], preferred_element_type=jnp.float32)
        # bias + tanh in f32 (VPU / EUP)
        h = jnp.tanh(h + b1_ref[:, sl])
        # linear2 partial product, accumulated into the f32 output block (VMEM)
        part = jnp.dot(h.astype(jnp.bfloat16), w2_ref[sl, :],
                       preferred_element_type=jnp.float32)
        if c == 0:
            o_ref[...] = part + b2_ref[...]
        else:
            o_ref[...] += part


@jax.jit
def additional_model_forward(x, w1, b1, w2, b2):
    B, D = x.shape
    H = w1.shape[1]

    # Lane-dense feature dim (pad D up to a multiple of 128 with zeros).
    Dp = _round_up(D, 128)

    # Batch tiling: full MXU rows when B is large, otherwise exactly two grid
    # steps so v7x megacore can use both TensorCores.
    Bp = _round_up(max(B, 16), 16)
    if Bp >= 512:
        tb = 256
        Bp = _round_up(Bp, tb)
    else:
        tb = Bp // 2
    grid = (Bp // tb,)

    # Zero-pad + cast MXU operands to bf16 (exact: padded rows/cols are zero).
    xp = jnp.pad(x.astype(jnp.bfloat16), ((0, Bp - B), (0, Dp - D)))
    w1p = jnp.pad(w1.astype(jnp.bfloat16), ((0, Dp - D), (0, 0)))
    w2p = jnp.pad(w2.astype(jnp.bfloat16), ((0, 0), (0, Dp - D)))
    b1r = b1.reshape(1, H).astype(jnp.float32)
    b2p = jnp.pad(b2.reshape(1, D).astype(jnp.float32), ((0, 0), (0, Dp - D)))

    hc = 256 if H % 256 == 0 else H

    out = pl.pallas_call(
        functools.partial(mlp_kernel, hc=hc),
        out_shape=jax.ShapeDtypeStruct((Bp, Dp), jnp.float32),
        grid_spec=pl.GridSpec(
            grid=grid,
            in_specs=[
                pl.BlockSpec((tb, Dp), lambda i: (i, 0)),   # x tile (lane-dense)
                pl.BlockSpec((Dp, H), lambda i: (0, 0)),    # W1 (resident)
                pl.BlockSpec((1, H), lambda i: (0, 0)),     # b1 (resident)
                pl.BlockSpec((H, Dp), lambda i: (0, 0)),    # W2 (resident)
                pl.BlockSpec((1, Dp), lambda i: (0, 0)),    # b2 (resident)
            ],
            out_specs=pl.BlockSpec((tb, Dp), lambda i: (i, 0)),
        ),
        compiler_params=pltpu.CompilerParams(
            dimension_semantics=("parallel",),
        ),
        cost_estimate=pl.CostEstimate(
            flops=4 * Bp * Dp * H,
            transcendentals=Bp * H,
            bytes_accessed=(Bp * Dp * 2 + Dp * H * 2 + H * Dp * 2
                            + H * 4 + Dp * 4 + Bp * Dp * 4),
        ),
    )(xp, w1p, b1r, w2p, b2p)

    return out[:B, :D].astype(x.dtype)


def init_params(key, in_dim, hidden):
    # PyTorch nn.Linear default init: U(-1/sqrt(fan_in), 1/sqrt(fan_in)).
    k1, k2, k3, k4 = jax.random.split(key, 4)
    bound1 = 1.0 / jnp.sqrt(in_dim)
    bound2 = 1.0 / jnp.sqrt(hidden)
    w1 = jax.random.uniform(k1, (in_dim, hidden), jnp.float32, -bound1, bound1)
    b1 = jax.random.uniform(k2, (hidden,), jnp.float32, -bound1, bound1)
    w2 = jax.random.uniform(k3, (hidden, in_dim), jnp.float32, -bound2, bound2)
    b2 = jax.random.uniform(k4, (in_dim,), jnp.float32, -bound2, bound2)
    return w1, b1, w2, b2


if __name__ == "__main__":
    # additional_model(N, n): feature dim = N + n. Pick N=24, n=8 -> D=32.
    N, n = 24, 8
    D = N + n
    HIDDEN = 1024
    BATCH = 64

    key = jax.random.PRNGKey(0)
    kx, kp = jax.random.split(key)
    x = jax.random.normal(kx, (BATCH, D), jnp.float32)
    w1, b1, w2, b2 = init_params(kp, D, HIDDEN)

    out = additional_model_forward(x, w1, b1, w2, b2)
    out = jax.block_until_ready(out)

    # Pure-JAX f32 reference; kernel uses bf16 MXU operands -> loose tolerance.
    ref = jnp.tanh(x @ w1 + b1[None, :]) @ w2 + b2[None, :]
    assert out.shape == (BATCH, D)
    assert jnp.allclose(out, ref, atol=3e-2, rtol=3e-2), float(
        jnp.max(jnp.abs(out - ref)))

    print("KERNEL_OK")
</pallas_src>

<mosaic_0001>
module attributes {stable_mosaic.version = 11 : i64} {
  func.func @mlp_kernel(%arg0: i32, %arg1: memref<32x128xbf16, #tpu.memory_space<vmem>>, %arg2: memref<128x1024xbf16, #tpu.memory_space<vmem>>, %arg3: memref<1x1024xf32, #tpu.memory_space<vmem>>, %arg4: memref<1024x128xbf16, #tpu.memory_space<vmem>>, %arg5: memref<1x128xf32, #tpu.memory_space<vmem>>, %arg6: memref<32x128xf32, #tpu.memory_space<vmem>>) attributes {dimension_semantics = [#tpu.dimension_semantics<parallel>], iteration_bounds = array<i64: 2>, scalar_prefetch = 0 : i64, scratch_operands = 0 : i64, tpu.core_type = #tpu.core_type<tc>, window_params = [{transform_indices = @transform_0, window_bounds = array<i64: 32, 128>}, {pipeline_mode = #tpu.pipeline_mode<synchronous>, transform_indices = @transform_1, window_bounds = array<i64: 128, 1024>}, {pipeline_mode = #tpu.pipeline_mode<synchronous>, transform_indices = @transform_2, window_bounds = array<i64: 1, 1024>}, {pipeline_mode = #tpu.pipeline_mode<synchronous>, transform_indices = @transform_3, window_bounds = array<i64: 1024, 128>}, {pipeline_mode = #tpu.pipeline_mode<synchronous>, transform_indices = @transform_4, window_bounds = array<i64: 1, 128>}, {transform_indices = @transform_5, window_bounds = array<i64: 32, 128>}]} {
    %c0 = arith.constant 0 : index
    %c0_0 = arith.constant 0 : index
    %0 = vector.load %arg1[%c0, %c0_0] : memref<32x128xbf16, #tpu.memory_space<vmem>>, vector<32x128xbf16>
    %c0_1 = arith.constant 0 : index
    %c0_2 = arith.constant 0 : index
    %1 = vector.load %arg2[%c0_1, %c0_2] : memref<128x1024xbf16, #tpu.memory_space<vmem>>, vector<128x256xbf16>
    %cst = arith.constant dense<0.000000e+00> : vector<32x256xf32>
    %2 = tpu.matmul %0, %1, %cst {dimension_numbers = #tpu.dot_dimension_numbers<[1], [0], [0], [1], [0, 0, 1, 1], [], []>} : vector<32x128xbf16>, vector<128x256xbf16>, vector<32x256xf32> -> vector<32x256xf32>
    %c0_3 = arith.constant 0 : index
    %c0_4 = arith.constant 0 : index
    %3 = vector.load %arg3[%c0_3, %c0_4] : memref<1x1024xf32, #tpu.memory_space<vmem>>, vector<1x256xf32>
    %4 = vector.broadcast %3 : vector<1x256xf32> to vector<32x256xf32>
    %5 = arith.addf %2, %4 : vector<32x256xf32>
    %6 = math.tanh %5 : vector<32x256xf32>
    %7 = arith.truncf %6 : vector<32x256xf32> to vector<32x256xbf16>
    %c0_5 = arith.constant 0 : index
    %c0_6 = arith.constant 0 : index
    %8 = vector.load %arg4[%c0_5, %c0_6] : memref<1024x128xbf16, #tpu.memory_space<vmem>>, vector<256x128xbf16>
    %cst_7 = arith.constant dense<0.000000e+00> : vector<32x128xf32>
    %9 = tpu.matmul %7, %8, %cst_7 {dimension_numbers = #tpu.dot_dimension_numbers<[1], [0], [0], [1], [0, 0, 1, 1], [], []>} : vector<32x256xbf16>, vector<256x128xbf16>, vector<32x128xf32> -> vector<32x128xf32>
    %c0_8 = arith.constant 0 : index
    %c0_9 = arith.constant 0 : index
    %10 = vector.load %arg5[%c0_8, %c0_9] : memref<1x128xf32, #tpu.memory_space<vmem>>, vector<1x128xf32>
    %11 = vector.broadcast %10 : vector<1x128xf32> to vector<32x128xf32>
    %12 = arith.addf %9, %11 : vector<32x128xf32>
    %c0_10 = arith.constant 0 : index
    %c0_11 = arith.constant 0 : index
    %13 = vector.load %arg6[%c0_10, %c0_11] : memref<32x128xf32, #tpu.memory_space<vmem>>, vector<32x128xf32>
    tpu.vector_store %arg6[%c0_10, %c0_11], %12 {strides = array<i32>} : memref<32x128xf32, #tpu.memory_space<vmem>>, vector<32x128xf32>,
    %c0_12 = arith.constant 0 : index
    %c256 = arith.constant 256 : index
    %14 = vector.load %arg2[%c0_12, %c256] : memref<128x1024xbf16, #tpu.memory_space<vmem>>, vector<128x256xbf16>
    %cst_13 = arith.constant dense<0.000000e+00> : vector<32x256xf32>
    %15 = tpu.matmul %0, %14, %cst_13 {dimension_numbers = #tpu.dot_dimension_numbers<[1], [0], [0], [1], [0, 0, 1, 1], [], []>} : vector<32x128xbf16>, vector<128x256xbf16>, vector<32x256xf32> -> vector<32x256xf32>
    %c0_14 = arith.constant 0 : index
    %c256_15 = arith.constant 256 : index
    %16 = vector.load %arg3[%c0_14, %c256_15] : memref<1x1024xf32, #tpu.memory_space<vmem>>, vector<1x256xf32>
    %17 = vector.broadcast %16 : vector<1x256xf32> to vector<32x256xf32>
    %18 = arith.addf %15, %17 : vector<32x256xf32>
    %19 = math.tanh %18 : vector<32x256xf32>
    %20 = arith.truncf %19 : vector<32x256xf32> to vector<32x256xbf16>
    %c256_16 = arith.constant 256 : index
    %c0_17 = arith.constant 0 : index
    %21 = vector.load %arg4[%c256_16, %c0_17] : memref<1024x128xbf16, #tpu.memory_space<vmem>>, vector<256x128xbf16>
    %cst_18 = arith.constant dense<0.000000e+00> : vector<32x128xf32>
    %22 = tpu.matmul %20, %21, %cst_18 {dimension_numbers = #tpu.dot_dimension_numbers<[1], [0], [0], [1], [0, 0, 1, 1], [], []>} : vector<32x256xbf16>, vector<256x128xbf16>, vector<32x128xf32> -> vector<32x128xf32>
    %c0_19 = arith.constant 0 : index
    %c0_20 = arith.constant 0 : index
    %23 = vector.load %arg6[%c0_19, %c0_20] : memref<32x128xf32, #tpu.memory_space<vmem>>, vector<32x128xf32>
    %24 = arith.addf %23, %22 : vector<32x128xf32>
    %c0_21 = arith.constant 0 : index
    %c0_22 = arith.constant 0 : index
    %25 = vector.load %arg6[%c0_21, %c0_22] : memref<32x128xf32, #tpu.memory_space<vmem>>, vector<32x128xf32>
    tpu.vector_store %arg6[%c0_21, %c0_22], %24 {strides = array<i32>} : memref<32x128xf32, #tpu.memory_space<vmem>>, vector<32x128xf32>,
    %c0_23 = arith.constant 0 : index
    %c512 = arith.constant 512 : index
    %26 = vector.load %arg2[%c0_23, %c512] : memref<128x1024xbf16, #tpu.memory_space<vmem>>, vector<128x256xbf16>
    %cst_24 = arith.constant dense<0.000000e+00> : vector<32x256xf32>
    %27 = tpu.matmul %0, %26, %cst_24 {dimension_numbers = #tpu.dot_dimension_numbers<[1], [0], [0], [1], [0, 0, 1, 1], [], []>} : vector<32x128xbf16>, vector<128x256xbf16>, vector<32x256xf32> -> vector<32x256xf32>
    %c0_25 = arith.constant 0 : index
    %c512_26 = arith.constant 512 : index
    %28 = vector.load %arg3[%c0_25, %c512_26] : memref<1x1024xf32, #tpu.memory_space<vmem>>, vector<1x256xf32>
    %29 = vector.broadcast %28 : vector<1x256xf32> to vector<32x256xf32>
    %30 = arith.addf %27, %29 : vector<32x256xf32>
    %31 = math.tanh %30 : vector<32x256xf32>
    %32 = arith.truncf %31 : vector<32x256xf32> to vector<32x256xbf16>
    %c512_27 = arith.constant 512 : index
    %c0_28 = arith.constant 0 : index
    %33 = vector.load %arg4[%c512_27, %c0_28] : memref<1024x128xbf16, #tpu.memory_space<vmem>>, vector<256x128xbf16>
    %cst_29 = arith.constant dense<0.000000e+00> : vector<32x128xf32>
    %34 = tpu.matmul %32, %33, %cst_29 {dimension_numbers = #tpu.dot_dimension_numbers<[1], [0], [0], [1], [0, 0, 1, 1], [], []>} : vector<32x256xbf16>, vector<256x128xbf16>, vector<32x128xf32> -> vector<32x128xf32>
    %c0_30 = arith.constant 0 : index
    %c0_31 = arith.constant 0 : index
    %35 = vector.load %arg6[%c0_30, %c0_31] : memref<32x128xf32, #tpu.memory_space<vmem>>, vector<32x128xf32>
    %36 = arith.addf %35, %34 : vector<32x128xf32>
    %c0_32 = arith.constant 0 : index
    %c0_33 = arith.constant 0 : index
    %37 = vector.load %arg6[%c0_32, %c0_33] : memref<32x128xf32, #tpu.memory_space<vmem>>, vector<32x128xf32>
    tpu.vector_store %arg6[%c0_32, %c0_33], %36 {strides = array<i32>} : memref<32x128xf32, #tpu.memory_space<vmem>>, vector<32x128xf32>,
    %c0_34 = arith.constant 0 : index
    %c768 = arith.constant 768 : index
    %38 = vector.load %arg2[%c0_34, %c768] : memref<128x1024xbf16, #tpu.memory_space<vmem>>, vector<128x256xbf16>
    %cst_35 = arith.constant dense<0.000000e+00> : vector<32x256xf32>
    %39 = tpu.matmul %0, %38, %cst_35 {dimension_numbers = #tpu.dot_dimension_numbers<[1], [0], [0], [1], [0, 0, 1, 1], [], []>} : vector<32x128xbf16>, vector<128x256xbf16>, vector<32x256xf32> -> vector<32x256xf32>
    %c0_36 = arith.constant 0 : index
    %c768_37 = arith.constant 768 : index
    %40 = vector.load %arg3[%c0_36, %c768_37] : memref<1x1024xf32, #tpu.memory_space<vmem>>, vector<1x256xf32>
    %41 = vector.broadcast %40 : vector<1x256xf32> to vector<32x256xf32>
    %42 = arith.addf %39, %41 : vector<32x256xf32>
    %43 = math.tanh %42 : vector<32x256xf32>
    %44 = arith.truncf %43 : vector<32x256xf32> to vector<32x256xbf16>
    %c768_38 = arith.constant 768 : index
    %c0_39 = arith.constant 0 : index
    %45 = vector.load %arg4[%c768_38, %c0_39] : memref<1024x128xbf16, #tpu.memory_space<vmem>>, vector<256x128xbf16>
    %cst_40 = arith.constant dense<0.000000e+00> : vector<32x128xf32>
    %46 = tpu.matmul %44, %45, %cst_40 {dimension_numbers = #tpu.dot_dimension_numbers<[1], [0], [0], [1], [0, 0, 1, 1], [], []>} : vector<32x256xbf16>, vector<256x128xbf16>, vector<32x128xf32> -> vector<32x128xf32>
    %c0_41 = arith.constant 0 : index
    %c0_42 = arith.constant 0 : index
    %47 = vector.load %arg6[%c0_41, %c0_42] : memref<32x128xf32, #tpu.memory_space<vmem>>, vector<32x128xf32>
    %48 = arith.addf %47, %46 : vector<32x128xf32>
    %c0_43 = arith.constant 0 : index
    %c0_44 = arith.constant 0 : index
    %49 = vector.load %arg6[%c0_43, %c0_44] : memref<32x128xf32, #tpu.memory_space<vmem>>, vector<32x128xf32>
    tpu.vector_store %arg6[%c0_43, %c0_44], %48 {strides = array<i32>} : memref<32x128xf32, #tpu.memory_space<vmem>>, vector<32x128xf32>,
    return
  }
  func.func @transform_0(%arg0: i32) -> (i32, i32) {
    %c0_i32 = arith.constant 0 : i32
    %c0_i32_0 = arith.constant 0 : i32
    return %arg0, %c0_i32 : i32, i32
  }
  func.func @transform_1(%arg0: i32) -> (i32, i32) {
    %c0_i32 = arith.constant 0 : i32
    %c0_i32_0 = arith.constant 0 : i32
    %c0_i32_1 = arith.constant 0 : i32
    return %c0_i32, %c0_i32_0 : i32, i32
  }
  func.func @transform_2(%arg0: i32) -> (i32, i32) {
    %c0_i32 = arith.constant 0 : i32
    %c0_i32_0 = arith.constant 0 : i32
    %c0_i32_1 = arith.constant 0 : i32
    return %c0_i32, %c0_i32_0 : i32, i32
  }
  func.func @transform_3(%arg0: i32) -> (i32, i32) {
    %c0_i32 = arith.constant 0 : i32
    %c0_i32_0 = arith.constant 0 : i32
    %c0_i32_1 = arith.constant 0 : i32
    return %c0_i32, %c0_i32_0 : i32, i32
  }
  func.func @transform_4(%arg0: i32) -> (i32, i32) {
    %c0_i32 = arith.constant 0 : i32
    %c0_i32_0 = arith.constant 0 : i32
    %c0_i32_1 = arith.constant 0 : i32
    return %c0_i32, %c0_i32_0 : i32, i32
  }
  func.func @transform_5(%arg0: i32) -> (i32, i32) {
    %c0_i32 = arith.constant 0 : i32
    %c0_i32_0 = arith.constant 0 : i32
    return %arg0, %c0_i32 : i32, i32
  }
}

</mosaic_0001>

<bundles_post_ra>
// kernel: additional_model_forward.1
= control target key start
LH: loop header
LB: loop body
LE: loop exit
PB: predicated region body
PF: predicated region fallthrough
CT: control target
= control target key end

     0   :  { %s2388_s18 = smov 0   ;;  %s3053_s0 = inlined_call_operand.vmem [shape: bf16[64,128], index: 0, kind: input, shape index: {}]   ;;  %s3054_s1 = inlined_call_operand.vmem [shape: bf16[128,1024], index: 1, kind: input, shape index: {}]   ;;  %s3055_s2 = inlined_call_operand.vmem [shape: f32[1,1024], index: 2, kind: input, shape index: {}]   ;;  %s3056_s3 = inlined_call_operand.vmem [shape: bf16[1024,128], index: 3, kind: input, shape index: {}]   ;;  %s3057_s4 = inlined_call_operand.vmem [shape: f32[1,128], index: 4, kind: input, shape index: {}]   ;;  %s3058_s5 = inlined_call_operand.vmem [shape: f32[64,128], index: 5, kind: output, shape index: {}]  }
   0x1 LB: > { %s1616_s19 = sadd.s32 4294967295, %s2356_s18   ;;  %p1620_p0 = scmp.ge.s32.totalorder %s2356_s18, 1  ;;  %s2356_s18 = sphi %s2388_s18, %s15_s18  }
   0x2   : > { %p188_p1 = scmp.lt.s32.totalorder %s2356_s18, 3 }
   0x4   : > { %p189_p2 = pnand %p1620_p0, %p188_p1 }
   0x5   : > { %s1621_s12 = sshll.u32 (!%p189_p2), %s1616_s19, 2 }
   0x6   : > { %192 = sbr.rel (%p189_p2) target bundleno = 449 (0x1c1), region = 40  ;;  %p217_p3 = scmp.lt.s32.totalorder (!%p189_p2), %s1621_s12, 7 }
   0xb   : > { %v1691_v0 = vld [vmem:[%s3054_s1 + $0x1c0] sm:$0xf]  ;;  %v2163_v2 = vld [vmem:[%s3054_s1 + $0x1c4] sm:$0xf]  ;;  %s3060_s12 = smov (!%p217_p3, %s1621_s12), 7 }
   0xc   : > { %v2164_v1 = vld [vmem:[%s3054_s1 + $0x1dc] sm:$0xf0]  ;;  %v1693_v4 = vld [vmem:[%s3054_s1 + $0x1e0] sm:$0xf0]  ;;  %s1622_s11 = sshll.u32 %s3060_s12, 2  ;;  %s1624_s28 = sshll.u32 %s3060_s12, 3 }
   0xd   : > { %v1692_v3 = vor.u32 %v2164_v1, %v1691_v0  ;;  %v1683_v5 = vld [vmem:[%s3054_s1 + $0x180] sm:$0xf]  ;;  %v1696_v7 = vor.u32 %v2163_v2, %v1693_v4  ;;  %v2161_v8 = vld [vmem:[%s3054_s1 + $0x184] sm:$0xf]  ;;  %v1819_v46 = vld [vmem:[%s3054_s1 + $0x1c8] sm:$0xf]  ;;  %s2512_s26 = scalar_lea.vmem %s3053_s0, %s1622_s11  ;;  %s3023_s6 = scalar_lea.vmem %s3058_s5, %s1624_s28 }
   0xe   : > { %v2162_v6 = vld [vmem:[%s3054_s1 + $0x19c] sm:$0xf0]  ;;  %v1685_v9 = vld [vmem:[%s3054_s1 + $0x1a0] sm:$0xf0]  ;;  %v2196_v47 = vld [vmem:[%s3054_s1 + $0x1e4] sm:$0xf0] }
   0xf   : > { %346 = vmatpush.bf16.msra.mxu0 %v1692_v3  ;;  %v1684_v10 = vor.u32 %v2162_v6, %v1683_v5  ;;  %365 = vmatpush.bf16.msra.mxu1 %v1696_v7  ;;  %v1688_v11 = vor.u32 %v2161_v8, %v1685_v9  ;;  %v1675_v12 = vld [vmem:[%s3054_s1 + $0x140] sm:$0xf]  ;;  %v2159_v14 = vld [vmem:[%s3054_s1 + $0x144] sm:$0xf]  ;;  %v2195_v48 = vld [vmem:[%s3054_s1 + $0x1cc] sm:$0xf]  ;;  %v1820_v52 = vor.u32 %v2196_v47, %v1819_v46 }
  0x10   : > { %v2160_v13 = vld [vmem:[%s3054_s1 + $0x15c] sm:$0xf0]  ;;  %v1677_v15 = vld [vmem:[%s3054_s1 + $0x160] sm:$0xf0]  ;;  %v1821_v49 = vld [vmem:[%s3054_s1 + $0x1e8] sm:$0xf0] }
  0x11   : > { %v1676_v16 = vor.u32 %v2160_v13, %v1675_v12  ;;  %v1680_v17 = vor.u32 %v2159_v14, %v1677_v15  ;;  %v1667_v18 = vld [vmem:[%s3054_s1 + $0x100] sm:$0xf]  ;;  %v2157_v20 = vld [vmem:[%s3054_s1 + $0x104] sm:$0xf]  ;;  %v1824_v53 = vor.u32 %v2195_v48, %v1821_v49  ;;  %v1811_v54 = vld [vmem:[%s3054_s1 + $0x188] sm:$0xf] }
  0x12   : > { %v2158_v19 = vld [vmem:[%s3054_s1 + $0x11c] sm:$0xf0]  ;;  %v1669_v21 = vld [vmem:[%s3054_s1 + $0x120] sm:$0xf0]  ;;  %v2194_v55 = vld [vmem:[%s3054_s1 + $0x1a4] sm:$0xf0] }
  0x13   : > { %347 = vmatpush.bf16.msra.mxu0 %v1684_v10  ;;  %366 = vmatpush.bf16.msra.mxu1 %v1688_v11  ;;  %v1668_v22 = vor.u32 %v2158_v19, %v1667_v18  ;;  %v1672_v23 = vor.u32 %v2157_v20, %v1669_v21  ;;  %v1659_v24 = vld [vmem:[%s3054_s1 + $0xc0] sm:$0xf]  ;;  %v2155_v26 = vld [vmem:[%s3054_s1 + $0xc4] sm:$0xf]  ;;  %v2193_v57 = vld [vmem:[%s3054_s1 + $0x18c] sm:$0xf]  ;;  %v1812_v59 = vor.u32 %v2194_v55, %v1811_v54 }
  0x14   : > { %v2156_v25 = vld [vmem:[%s3054_s1 + $0xdc] sm:$0xf0]  ;;  %v1661_v27 = vld [vmem:[%s3054_s1 + $0xe0] sm:$0xf0]  ;;  %v1813_v58 = vld [vmem:[%s3054_s1 + $0x1a8] sm:$0xf0] }
  0x15   : > { %v1660_v28 = vor.u32 %v2156_v25, %v1659_v24  ;;  %v1664_v29 = vor.u32 %v2155_v26, %v1661_v27  ;;  %v1651_v30 = vld [vmem:[%s3054_s1 + $0x80] sm:$0xf]  ;;  %v2153_v32 = vld [vmem:[%s3054_s1 + $0x84] sm:$0xf]  ;;  %v1816_v60 = vor.u32 %v2193_v57, %v1813_v58  ;;  %v1803_v61 = vld [vmem:[%s3054_s1 + $0x148] sm:$0xf] }
  0x16   : > { %v2154_v31 = vld [vmem:[%s3054_s1 + $0x9c] sm:$0xf0]  ;;  %v1653_v33 = vld [vmem:[%s3054_s1 + $0xa0] sm:$0xf0]  ;;  %v2192_v62 = vld [vmem:[%s3054_s1 + $0x164] sm:$0xf0] }
  0x17   : > { %348 = vmatpush.bf16.msra.mxu0 %v1676_v16  ;;  %367 = vmatpush.bf16.msra.mxu1 %v1680_v17  ;;  %v1652_v34 = vor.u32 %v2154_v31, %v1651_v30  ;;  %v1643_v35 = vld [vmem:[%s3054_s1 + $0x40] sm:$0xf]  ;;  %v1656_v36 = vor.u32 %v2153_v32, %v1653_v33  ;;  %v2151_v38 = vld [vmem:[%s3054_s1 + $0x44] sm:$0xf]  ;;  %v2191_v63 = vld [vmem:[%s3054_s1 + $0x14c] sm:$0xf]  ;;  %v1804_v1 = vor.u32 %v2192_v62, %v1803_v61 }
  0x18   : > { %v2152_v37 = vld [vmem:[%s3054_s1 + $0x5c] sm:$0xf0]  ;;  %v1645_v39 = vld [vmem:[%s3054_s1 + $0x60] sm:$0xf0]  ;;  %v1805_v0 = vld [vmem:[%s3054_s1 + $0x168] sm:$0xf0] }
  0x19   : > { %v1644_v40 = vor.u32 %v2152_v37, %v1643_v35  ;;  %v1635_v41 = vld [vmem:[%s3054_s1] sm:$0xf]  ;;  %v1648_v42 = vor.u32 %v2151_v38, %v1645_v39  ;;  %v2149_v44 = vld [vmem:[%s3054_s1 + $0x4] sm:$0xf]  ;;  %v1808_v2 = vor.u32 %v2191_v63, %v1805_v0  ;;  %v1795_v3 = vld [vmem:[%s3054_s1 + $0x108] sm:$0xf] }
  0x1a   : > { %v2150_v43 = vld [vmem:[%s3054_s1 + $0x1c] sm:$0xf0]  ;;  %v1637_v45 = vld [vmem:[%s3054_s1 + $0x20] sm:$0xf0]  ;;  %v2190_v4 = vld [vmem:[%s3054_s1 + $0x124] sm:$0xf0] }
  0x1b   : > { %349 = vmatpush.bf16.msra.mxu0 %v1668_v22  ;;  %368 = vmatpush.bf16.msra.mxu1 %v1672_v23  ;;  %v1636_v50 = vor.u32 %v2150_v43, %v1635_v41  ;;  %v1640_v51 = vor.u32 %v2149_v44, %v1637_v45  ;;  %v2521_v56 = vld [vmem:[%s2512_s26] sm:$0xff]  ;;  %v2189_v5 = vld [vmem:[%s3054_s1 + $0x10c] sm:$0xf]  ;;  %v1796_v7 = vor.u32 %v2190_v4, %v1795_v3  ;;  %v1787_v9 = vld [vmem:[%s3054_s1 + $0xc8] sm:$0xf] }
  0x1c   : > { %v1797_v6 = vld [vmem:[%s3054_s1 + $0x128] sm:$0xf0]  ;;  %v2188_v10 = vld [vmem:[%s3054_s1 + $0xe4] sm:$0xf0]  ;;  %v1947_v32 = vld [vmem:[%s3054_s1 + $0x1d0] sm:$0xf] }
  0x1d   : > { %v1800_v8 = vor.u32 %v2189_v5, %v1797_v6  ;;  %v2187_v11 = vld [vmem:[%s3054_s1 + $0xcc] sm:$0xf]  ;;  %v1788_v13 = vor.u32 %v2188_v10, %v1787_v9  ;;  %v1779_v15 = vld [vmem:[%s3054_s1 + $0x88] sm:$0xf]  ;;  %v2228_v33 = vld [vmem:[%s3054_s1 + $0x1ec] sm:$0xf0] }
  0x1e   : > { %v1789_v12 = vld [vmem:[%s3054_s1 + $0xe8] sm:$0xf0]  ;;  %v2186_v16 = vld [vmem:[%s3054_s1 + $0xa4] sm:$0xf0]  ;;  %v1949_v35 = vld [vmem:[%s3054_s1 + $0x1f0] sm:$0xf0]  ;;  %v1948_v38 = vor.u32 %v2228_v33, %v1947_v32 }
  0x1f   : > { %350 = vmatpush.bf16.msra.mxu0 %v1660_v28  ;;  %369 = vmatpush.bf16.msra.mxu1 %v1664_v29  ;;  %v1792_v14 = vor.u32 %v2187_v11, %v1789_v12  ;;  %v2574_v17 = vld [vmem:[%s2512_s26 + $0x8] sm:$0xff]  ;;  %v1780_v20 = vor.u32 %v2186_v16, %v1779_v15  ;;  %v2226_v41 = vld [vmem:[%s3054_s1 + $0x1ac] sm:$0xf0]  ;;  %v1941_v43 = vld [vmem:[%s3054_s1 + $0x1b0] sm:$0xf0] }
  0x20   : > { %v2185_v18 = vld [vmem:[%s3054_s1 + $0x8c] sm:$0xf]  ;;  %v1771_v22 = vld [vmem:[%s3054_s1 + $0x48] sm:$0xf]  ;;  %v1931_v46 = vld [vmem:[%s3054_s1 + $0x150] sm:$0xf] }
  0x21   : > { %v1781_v19 = vld [vmem:[%s3054_s1 + $0xa8] sm:$0xf0]  ;;  %v2184_v23 = vld [vmem:[%s3054_s1 + $0x64] sm:$0xf0]  ;;  %v2224_v47 = vld [vmem:[%s3054_s1 + $0x16c] sm:$0xf0] }
  0x22   : > { %v1784_v21 = vor.u32 %v2185_v18, %v1781_v19  ;;  %v2183_v24 = vld [vmem:[%s3054_s1 + $0x4c] sm:$0xf]  ;;  %v1772_v26 = vor.u32 %v2184_v23, %v1771_v22  ;;  %v1763_v28 = vld [vmem:[%s3054_s1 + $0x8] sm:$0xf]  ;;  %v2223_v48 = vld [vmem:[%s3054_s1 + $0x154] sm:$0xf] }
  0x23   : > { %351 = vmatpush.bf16.msra.mxu0 %v1652_v34  ;;  %370 = vmatpush.bf16.msra.mxu1 %v1656_v36  ;;  %v1773_v25 = vld [vmem:[%s3054_s1 + $0x68] sm:$0xf0]  ;;  %v2182_v29 = vld [vmem:[%s3054_s1 + $0x24] sm:$0xf0]  ;;  %v2227_v34 = vld [vmem:[%s3054_s1 + $0x1d4] sm:$0xf] }
  0x24   : > { %v1776_v27 = vor.u32 %v2183_v24, %v1773_v25  ;;  %v2181_v30 = vld [vmem:[%s3054_s1 + $0xc] sm:$0xf]  ;;  %v1764_v36 = vor.u32 %v2182_v29, %v1763_v28  ;;  %v1952_v39 = vor.u32 %v2227_v34, %v1949_v35  ;;  %v1933_v49 = vld [vmem:[%s3054_s1 + $0x170] sm:$0xf0]  ;;  %v2075_v18 = vld [vmem:[%s3054_s1 + $0x1d8] sm:$0xf] }
  0x25   : > { %v1765_v31 = vld [vmem:[%s3054_s1 + $0x28] sm:$0xf0]  ;;  %v2221_v54 = vld [vmem:[%s3054_s1 + $0x114] sm:$0xf]  ;;  %v2260_v19 = vld [vmem:[%s3054_s1 + $0x1f4] sm:$0xf0] }
  0x26   : > { %v1768_v37 = vor.u32 %v2181_v30, %v1765_v31  ;;  %v1925_v55 = vld [vmem:[%s3054_s1 + $0x130] sm:$0xf0]  ;;  %v2076_v24 = vor.u32 %v2260_v19, %v2075_v18  ;;  %v2257_v28 = vld [vmem:[%s3054_s1 + $0x19c] sm:$0xf]  ;;  %v2059_v32 = vld [vmem:[%s3054_s1 + $0x158] sm:$0xf] }
  0x27   : > { %352 = vmatpush.bf16.msra.mxu0 %v1644_v40  ;;  %371 = vmatpush.bf16.msra.mxu1 %v1648_v42  ;;  %v1939_v40 = vld [vmem:[%s3054_s1 + $0x190] sm:$0xf]  ;;  %v2225_v42 = vld [vmem:[%s3054_s1 + $0x194] sm:$0xf]  ;;  %v1928_v58 = vor.u32 %v2221_v54, %v1925_v55  ;;  %v2069_v29 = vld [vmem:[%s3054_s1 + $0x1b8] sm:$0xf0] }
  0x28   : > { %v1940_v44 = vor.u32 %v2226_v41, %v1939_v40  ;;  %v1944_v45 = vor.u32 %v2225_v42, %v1941_v43  ;;  %v2219_v61 = vld [vmem:[%s3054_s1 + $0xd4] sm:$0xf]  ;;  %v2072_v31 = vor.u32 %v2257_v28, %v2069_v29  ;;  %v2256_v33 = vld [vmem:[%s3054_s1 + $0x174] sm:$0xf0]  ;;  %v2255_v34 = vld [vmem:[%s3054_s1 + $0x15c] sm:$0xf] }
  0x29   : > { %v1917_v62 = vld [vmem:[%s3054_s1 + $0xf0] sm:$0xf0]  ;;  %v2061_v35 = vld [vmem:[%s3054_s1 + $0x178] sm:$0xf0]  ;;  %v2174_v18 = vld [vmem:[%s3056_s3 + $0x48] sm:$0xff] }
  0x2a   : > { %v1920_v0 = vor.u32 %v2219_v61, %v1917_v62  ;;  %v2217_v3 = vld [vmem:[%s3054_s1 + $0x94] sm:$0xf]  ;;  %v2253_v40 = vld [vmem:[%s3054_s1 + $0x11c] sm:$0xf]  ;;  %v2165_v19 = vld [vmem:[%s3056_s3] sm:$0xff] }
  0x2b   : > { %353 = vmatpush.bf16.msra.mxu0 %v1636_v50  ;;  %372 = vmatpush.bf16.msra.mxu1 %v1640_v51  ;;  %v1932_v50 = vor.u32 %v2224_v47, %v1931_v46  ;;  %v1936_v51 = vor.u32 %v2223_v48, %v1933_v49  ;;  %v1909_v4 = vld [vmem:[%s3054_s1 + $0xb0] sm:$0xf0]  ;;  %v2053_v41 = vld [vmem:[%s3054_s1 + $0x138] sm:$0xf0]  ;;  %v2201_v28 = vld [vmem:[%s3056_s3 + $0xa0] sm:$0xff] }
  0x2c   : > { %v1912_v6 = vor.u32 %v2217_v3, %v1909_v4  ;;  %v2215_v9 = vld [vmem:[%s3054_s1 + $0x54] sm:$0xf]  ;;  %v2056_v43 = vor.u32 %v2253_v40, %v2053_v41  ;;  %v2251_v46 = vld [vmem:[%s3054_s1 + $0xdc] sm:$0xf]  ;;  %v2209_v29 = vld [vmem:[%s3056_s3 + $0xe0] sm:$0xff] }
  0x2d   : > { %v1901_v10 = vld [vmem:[%s3054_s1 + $0x70] sm:$0xf0]  ;;  %v2045_v47 = vld [vmem:[%s3054_s1 + $0xf8] sm:$0xf0] }
  0x2e   : > { %354 = vmatmul.bf16.vlgmr.msra.gmra.mxu0 %v2521_v56  ;;  %373 = vmatmul.bf16.vlgmr.msra.gmra.mxu1 %v2521_v56  ;;  %v1904_v12 = vor.u32 %v2215_v9, %v1901_v10  ;;  %v2213_v15 = vld [vmem:[%s3054_s1 + $0x14] sm:$0xf]  ;;  %v2048_v49 = vor.u32 %v2251_v46, %v2045_v47  ;;  %v2172_v4 = vld [vmem:[%s3056_s3 + $0x38] sm:$0xff]  ;;  %v2170_v9 = vld [vmem:[%s3056_s3 + $0x28] sm:$0xff] }
  0x2f   : > { %672 = vmatpush.bf16.msrb.mxu0 %v1820_v52  ;;  %691 = vmatpush.bf16.msrb.mxu1 %v1824_v53  ;;  %v1923_v52 = vld [vmem:[%s3054_s1 + $0x110] sm:$0xf]  ;;  %v1893_v16 = vld [vmem:[%s3054_s1 + $0x30] sm:$0xf0]  ;;  %v2178_v10 = vld [vmem:[%s3056_s3 + $0x68] sm:$0xff] }
  0x30   : > { %v2222_v53 = vld [vmem:[%s3054_s1 + $0x12c] sm:$0xf0]  ;;  %v1896_v23 = vor.u32 %v2213_v15, %v1893_v16  ;;  %528 = vmatpush.bf16.msra.mxu2 %v2172_v4  ;;  %v586_v4 = vld [vmem:[%s3055_s2 + $0x2] sm:$0x3] }
  0x31   : > { %v1924_v57 = vor.u32 %v2222_v53, %v1923_v52  ;;  %v2249_v52 = vld [vmem:[%s3054_s1 + $0x9c] sm:$0xf]  ;;  %v2167_v15 = vld [vmem:[%s3056_s3 + $0x10] sm:$0xff] }
  0x32   : > { %v2037_v53 = vld [vmem:[%s3054_s1 + $0xb8] sm:$0xf0]  ;;  %v2175_v16 = vld [vmem:[%s3056_s3 + $0x50] sm:$0xff] }
  0x33   : > { %673 = vmatpush.bf16.msrb.mxu0 %v1812_v59  ;;  %692 = vmatpush.bf16.msrb.mxu1 %v1816_v60  ;;  %v1915_v59 = vld [vmem:[%s3054_s1 + $0xd0] sm:$0xf]  ;;  %v2040_v55 = vor.u32 %v2249_v52, %v2037_v53 }
  0x34   : > { %v2220_v60 = vld [vmem:[%s3054_s1 + $0xec] sm:$0xf0] }
  0x35   : > { %v1916_v63 = vor.u32 %v2220_v60, %v1915_v59  ;;  %v2247_v59 = vld [vmem:[%s3054_s1 + $0x5c] sm:$0xf] }
  0x36   : > { %v2029_v60 = vld [vmem:[%s3054_s1 + $0x78] sm:$0xf0] }
  0x37   : > { %674 = vmatpush.bf16.msrb.mxu0 %v1804_v1  ;;  %693 = vmatpush.bf16.msrb.mxu1 %v1808_v2  ;;  %v1907_v1 = vld [vmem:[%s3054_s1 + $0x90] sm:$0xf]  ;;  %v2032_v62 = vor.u32 %v2247_v59, %v2029_v60 }
  0x38   : > { %v2218_v2 = vld [vmem:[%s3054_s1 + $0xac] sm:$0xf0] }
  0x39   : > { %v1908_v5 = vor.u32 %v2218_v2, %v1907_v1  ;;  %v2245_v1 = vld [vmem:[%s3054_s1 + $0x1c] sm:$0xf] }
  0x3a   : > { %v2021_v2 = vld [vmem:[%s3054_s1 + $0x38] sm:$0xf0] }
  0x3b   : > { %675 = vmatpush.bf16.msrb.mxu0 %v1796_v7  ;;  %694 = vmatpush.bf16.msrb.mxu1 %v1800_v8  ;;  %v1899_v7 = vld [vmem:[%s3054_s1 + $0x50] sm:$0xf] }
  0x3c   : > { %v2216_v8 = vld [vmem:[%s3054_s1 + $0x6c] sm:$0xf0] }
  0x3d   : > { %v1900_v11 = vor.u32 %v2216_v8, %v1899_v7  ;;  %v2171_v7 = vld [vmem:[%s3056_s3 + $0x30] sm:$0xff] }
  0x3e   : > { %359 = vmatmul.bf16.gmra.mxu0 %v2574_v17  ;;  %378 = vmatmul.bf16.gmra.mxu1 %v2574_v17  ;;  %v2179_v8 = vld [vmem:[%s3056_s3 + $0x70] sm:$0xff] }
  0x3f   : > { %676 = vmatpush.bf16.msrb.mxu0 %v1788_v13  ;;  %695 = vmatpush.bf16.msrb.mxu1 %v1792_v14  ;;  %v1891_v13 = vld [vmem:[%s3054_s1 + $0x10] sm:$0xf] }
  0x40   : > { %v2214_v14 = vld [vmem:[%s3054_s1 + $0x2c] sm:$0xf0]  ;;  %529 = vmatpush.bf16.msra.mxu2 %v2171_v7 }
  0x41   : > { %v1892_v22 = vor.u32 %v2214_v14, %v1891_v13  ;;  %v2168_v13 = vld [vmem:[%s3056_s3 + $0x18] sm:$0xff] }
  0x42   : > { %v2176_v14 = vld [vmem:[%s3056_s3 + $0x58] sm:$0xff] }
  0x43   : > { %677 = vmatpush.bf16.msrb.mxu0 %v1780_v20  ;;  %696 = vmatpush.bf16.msrb.mxu1 %v1784_v21  ;;  %v2259_v20 = vld [vmem:[%s3054_s1 + $0x1dc] sm:$0xf] }
  0x44   : > { %v2077_v21 = vld [vmem:[%s3054_s1 + $0x1f8] sm:$0xf0]  ;;  %530 = vmatpush.bf16.msra.mxu2 %v2170_v9  ;;  %v2241_v9 = vld [vmem:[%s3056_s3 + $0x160] sm:$0xff] }
  0x45   : > { %v2080_v25 = vor.u32 %v2259_v20, %v2077_v21  ;;  %v2173_v20 = vld [vmem:[%s3056_s3 + $0x40] sm:$0xff]  ;;  %v2204_v21 = vld [vmem:[%s3056_s3 + $0xb8] sm:$0xff] }
  0x47   : > { %678 = vmatpush.bf16.msrb.mxu0 %v1772_v26  ;;  %697 = vmatpush.bf16.msrb.mxu1 %v1776_v27  ;;  %v2067_v26 = vld [vmem:[%s3054_s1 + $0x198] sm:$0xf] }
  0x48   : > { %v2258_v27 = vld [vmem:[%s3054_s1 + $0x1b4] sm:$0xf0] }
  0x49   : > { %v2068_v30 = vor.u32 %v2258_v27, %v2067_v26  ;;  %v248_v26 = vld [vmem:[%s3055_s2] sm:$0x3] }
  0x4b   : > { %679 = vmatpush.bf16.msrb.mxu0 %v1764_v36  ;;  %698 = vmatpush.bf16.msrb.mxu1 %v1768_v37  ;;  %v2060_v36 = vor.u32 %v2256_v33, %v2059_v32  ;;  %v2064_v37 = vor.u32 %v2255_v34, %v2061_v35  ;;  %v251_v32 = vperm.slane %v248_v26, 1  ;;  %v2200_v33 = vld [vmem:[%s3056_s3 + $0x98] sm:$0xff] }
  0x4c   : > { %v2208_v34 = vld [vmem:[%s3056_s3 + $0xd8] sm:$0xff] }
  0x4e   : > { %680 = vmatmul.bf16.vlgmr.msrb.gmra.mxu0 %v2521_v56  ;;  %699 = vmatmul.bf16.vlgmr.msrb.gmra.mxu1 %v2521_v56 }
  0x4f   : > { %1002 = vmatpush.bf16.msra.mxu0 %v1948_v38  ;;  %1021 = vmatpush.bf16.msra.mxu1 %v1952_v39  ;;  %v2051_v38 = vld [vmem:[%s3054_s1 + $0x118] sm:$0xf] }
  0x50   : > { %v2254_v39 = vld [vmem:[%s3054_s1 + $0x134] sm:$0xf0] }
  0x51   : > { %v2052_v42 = vor.u32 %v2254_v39, %v2051_v38  ;;  %v2199_v38 = vld [vmem:[%s3056_s3 + $0x90] sm:$0xff] }
  0x52   : > { %v2207_v39 = vld [vmem:[%s3056_s3 + $0xd0] sm:$0xff] }
  0x53   : > { %1003 = vmatpush.bf16.msra.mxu0 %v1940_v44  ;;  %1022 = vmatpush.bf16.msra.mxu1 %v1944_v45  ;;  %v2043_v44 = vld [vmem:[%s3054_s1 + $0xd8] sm:$0xf] }
  0x54   : > { %v2252_v45 = vld [vmem:[%s3054_s1 + $0xf4] sm:$0xf0] }
  0x55   : > { %v2044_v48 = vor.u32 %v2252_v45, %v2043_v44  ;;  %v2206_v44 = vld [vmem:[%s3056_s3 + $0xc8] sm:$0xff] }
  0x57   : > { %1004 = vmatpush.bf16.msra.mxu0 %v1932_v50  ;;  %1023 = vmatpush.bf16.msra.mxu1 %v1936_v51  ;;  %v2035_v50 = vld [vmem:[%s3054_s1 + $0x98] sm:$0xf] }
  0x58   : > { %v2250_v51 = vld [vmem:[%s3054_s1 + $0xb4] sm:$0xf0] }
  0x59   : > { %v2036_v54 = vor.u32 %v2250_v51, %v2035_v50 }
  0x5b   : > { %1005 = vmatpush.bf16.msra.mxu0 %v1924_v57  ;;  %1024 = vmatpush.bf16.msra.mxu1 %v1928_v58  ;;  %v2027_v57 = vld [vmem:[%s3054_s1 + $0x58] sm:$0xf] }
  0x5c   : > { %v2248_v58 = vld [vmem:[%s3054_s1 + $0x74] sm:$0xf0] }
  0x5d   : > { %v2028_v61 = vor.u32 %v2248_v58, %v2027_v57  ;;  %v2244_v57 = vld [vmem:[%s3056_s3 + $0x178] sm:$0xff] }
  0x5e   : > { %685 = vmatmul.bf16.gmra.mxu0 %v2574_v17  ;;  %704 = vmatmul.bf16.gmra.mxu1 %v2574_v17 }
  0x5f   : > { %1006 = vmatpush.bf16.msra.mxu0 %v1916_v63  ;;  %1025 = vmatpush.bf16.msra.mxu1 %v1920_v0  ;;  %v2019_v63 = vld [vmem:[%s3054_s1 + $0x18] sm:$0xf] }
  0x60   : > { %v2246_v0 = vld [vmem:[%s3054_s1 + $0x34] sm:$0xf0] }
  0x61   : > { %v2020_v3 = vor.u32 %v2246_v0, %v2019_v63 }
  0x63   : > { %1007 = vmatpush.bf16.msra.mxu0 %v1908_v5  ;;  %1026 = vmatpush.bf16.msra.mxu1 %v1912_v6  ;;  %v2180_v5 = vld [vmem:[%s3056_s3 + $0x78] sm:$0xff]  ;;  %v2024_v6 = vor.u32 %v2245_v1, %v2021_v2  ;;  %v2234_v2 = vld [vmem:[%s3056_s3 + $0x128] sm:$0xff] }
  0x64   : > { %547 = vmatpush.bf16.msra.mxu3 %v2180_v5 }
  0x67   : > { %1008 = vmatpush.bf16.msra.mxu0 %v1900_v11  ;;  %1027 = vmatpush.bf16.msra.mxu1 %v1904_v12  ;;  %v2169_v11 = vld [vmem:[%s3056_s3 + $0x20] sm:$0xff] }
  0x68   : > { %548 = vmatpush.bf16.msra.mxu3 %v2179_v8  ;;  %v2177_v12 = vld [vmem:[%s3056_s3 + $0x60] sm:$0xff]  ;;  %531 = vmatpush.bf16.msra.mxu2 %v2169_v11  ;;  %v588_v11 = vperm.slane %v586_v4, 0 }
  0x69   : > { %v2233_v8 = vld [vmem:[%s3056_s3 + $0x120] sm:$0xff] }
  0x6b   : > { %1009 = vmatpush.bf16.msra.mxu0 %v1892_v22  ;;  %1028 = vmatpush.bf16.msra.mxu1 %v1896_v23  ;;  %v2212_v22 = vld [vmem:[%s3056_s3 + $0xf8] sm:$0xff]  ;;  %v2203_v23 = vld [vmem:[%s3056_s3 + $0xb0] sm:$0xff] }
  0x6c   : > { %549 = vmatpush.bf16.msra.mxu3 %v2178_v10  ;;  %532 = vmatpush.bf16.msra.mxu2 %v2168_v13 }
  0x6e   : > { %1010 = vmatmul.bf16.vlgmr.msra.gmra.mxu0 %v2521_v56  ;;  %1029 = vmatmul.bf16.vlgmr.msra.gmra.mxu1 %v2521_v56 }
  0x6f   : > { %1332 = vmatpush.bf16.msrb.mxu0 %v2076_v24  ;;  %1351 = vmatpush.bf16.msrb.mxu1 %v2080_v25  ;;  %v2211_v24 = vld [vmem:[%s3056_s3 + $0xf0] sm:$0xff]  ;;  %v2210_v25 = vld [vmem:[%s3056_s3 + $0xe8] sm:$0xff] }
  0x70   : > { %550 = vmatpush.bf16.msra.mxu3 %v2177_v12  ;;  %533 = vmatpush.bf16.msra.mxu2 %v2167_v15 }
  0x73   : > { %1333 = vmatpush.bf16.msrb.mxu0 %v2068_v30  ;;  %1352 = vmatpush.bf16.msrb.mxu1 %v2072_v31  ;;  %v250_v30 = vperm.slane %v248_v26, 0  ;;  %v2230_v26 = vld [vmem:[%s3056_s3 + $0x108] sm:$0xff] }
  0x74   : > { %551 = vmatpush.bf16.msra.mxu3 %v2176_v14  ;;  %v589_v14 = vperm.slane %v586_v4, 1 }
  0x77   : > { %1334 = vmatpush.bf16.msrb.mxu0 %v2060_v36  ;;  %1353 = vmatpush.bf16.msrb.mxu1 %v2064_v37 }
  0x78   : > { %552 = vmatpush.bf16.msra.mxu3 %v2175_v16 }
  0x7b   : > { %1335 = vmatpush.bf16.msrb.mxu0 %v2052_v42  ;;  %1354 = vmatpush.bf16.msrb.mxu1 %v2056_v43  ;;  %v2198_v43 = vld [vmem:[%s3056_s3 + $0x88] sm:$0xff] }
  0x7c   : > { %553 = vmatpush.bf16.msra.mxu3 %v2174_v18  ;;  %v2240_v18 = vld [vmem:[%s3056_s3 + $0x158] sm:$0xff] }
  0x7e   : > { %1015 = vmatmul.bf16.gmra.mxu0 %v2574_v17  ;;  %1034 = vmatmul.bf16.gmra.mxu1 %v2574_v17 }
  0x7f   : > { %1336 = vmatpush.bf16.msrb.mxu0 %v2044_v48  ;;  %1355 = vmatpush.bf16.msrb.mxu1 %v2048_v49  ;;  %v2197_v48 = vld [vmem:[%s3056_s3 + $0x80] sm:$0xff] }
  0x80   : > { %554 = vmatpush.bf16.msra.mxu3 %v2173_v20  ;;  %v2205_v49 = vld [vmem:[%s3056_s3 + $0xc0] sm:$0xff] }
  0x83   : > { %1337 = vmatpush.bf16.msrb.mxu0 %v2036_v54  ;;  %1356 = vmatpush.bf16.msrb.mxu1 %v2040_v55  ;;  %v2236_v55 = vld [vmem:[%s3056_s3 + $0x138] sm:$0xff] }
  0x84   : > { %869 = vmatpush.bf16.msrb.mxu3 %v2212_v22  ;;  %v2231_v22 = vld [vmem:[%s3056_s3 + $0x110] sm:$0xff] }
  0x87   : > { %1338 = vmatpush.bf16.msrb.mxu0 %v2028_v61  ;;  %1357 = vmatpush.bf16.msrb.mxu1 %v2032_v62  ;;  %v2235_v61 = vld [vmem:[%s3056_s3 + $0x130] sm:$0xff] }
  0x88   : > { %870 = vmatpush.bf16.msrb.mxu3 %v2211_v24  ;;  %v2243_v62 = vld [vmem:[%s3056_s3 + $0x170] sm:$0xff] }
  0x8b   : > { %1339 = vmatpush.bf16.msrb.mxu0 %v2020_v3  ;;  %1358 = vmatpush.bf16.msrb.mxu1 %v2024_v6  ;;  %v2242_v3 = vld [vmem:[%s3056_s3 + $0x168] sm:$0xff] }
  0x8c   : > { %871 = vmatpush.bf16.msrb.mxu3 %v2210_v25 }
  0x8e   : > { %1340 = vmatmul.bf16.vlgmr.msrb.gmra.mxu0 %v2521_v56  ;;  %1359 = vmatmul.bf16.vlgmr.msrb.gmra.mxu1 %v2521_v56  ;;  %v2166_v56 = vld [vmem:[%s3056_s3 + $0x8] sm:$0xff] }
  0x8f   : > { %534 = vmatpush.bf16.msra.mxu2 %v2166_v56  ;;  %v2232_v56 = vld [vmem:[%s3056_s3 + $0x118] sm:$0xff] }
  0x90   : > { %872 = vmatpush.bf16.msrb.mxu3 %v2209_v29 }
  0x93   : > { %535 = vmatpush.bf16.msra.mxu2 %v2165_v19 }
  0x94   : > { %873 = vmatpush.bf16.msrb.mxu3 %v2208_v34 }
  0x97   : > { %850 = vmatpush.bf16.msrb.mxu2 %v2204_v21 }
  0x98   : > { %874 = vmatpush.bf16.msrb.mxu3 %v2207_v39  ;;  %v2276_v39 = vld [vmem:[%s3056_s3 + $0x1f8] sm:$0xff] }
  0x9b   : > { %851 = vmatpush.bf16.msrb.mxu2 %v2203_v23  ;;  %v2239_v23 = vld [vmem:[%s3056_s3 + $0x150] sm:$0xff] }
  0x9c   : > { %875 = vmatpush.bf16.msrb.mxu3 %v2206_v44  ;;  %v2275_v44 = vld [vmem:[%s3056_s3 + $0x1f0] sm:$0xff] }
  0x9e   : > { %1345 = vmatmul.bf16.gmra.mxu0 %v2574_v17  ;;  %1364 = vmatmul.bf16.gmra.mxu1 %v2574_v17  ;;  %v2202_v17 = vld [vmem:[%s3056_s3 + $0xa8] sm:$0xff] }
  0x9f   : > { %852 = vmatpush.bf16.msrb.mxu2 %v2202_v17 }
  0xa0   : > { %876 = vmatpush.bf16.msrb.mxu3 %v2205_v49  ;;  %v2274_v49 = vld [vmem:[%s3056_s3 + $0x1e8] sm:$0xff] }
  0xa3   : > { %853 = vmatpush.bf16.msrb.mxu2 %v2201_v28 }
  0xa7   : > { %854 = vmatpush.bf16.msrb.mxu2 %v2200_v33 }
  0xab   : > { %v355_v27 = vpop.f32.mrf.mxu0  ;;  %v374_v31 = vpop.f32.mrf.mxu1  ;;  %855 = vmatpush.bf16.msrb.mxu2 %v2199_v38  ;;  %v2268_v38 = vld [vmem:[%s3056_s3 + $0x1b8] sm:$0xff] }
  0xac   : > { %v356_v35 = vadd.f32 %v355_v27, %v250_v30  ;;  %v375_v36 = vadd.f32 %v374_v31, %v251_v32  ;;  %v2238_v27 = vld [vmem:[%s3056_s3 + $0x148] sm:$0xff]  ;;  %v2229_v31 = vld [vmem:[%s3056_s3 + $0x100] sm:$0xff] }
  0xae   : > { %2286 = vtanh.f32 %v356_v35 }
  0xaf   : > { %2288 = vtanh.f32 %v375_v36  ;;  %856 = vmatpush.bf16.msrb.mxu2 %v2198_v43  ;;  %v2267_v43 = vld [vmem:[%s3056_s3 + $0x1b0] sm:$0xff] }
  0xb3   : > { %v357_v37 = vpop.f32.mrf.mxu0  ;;  %v376_v41 = vpop.f32.mrf.mxu1  ;;  %857 = vmatpush.bf16.msrb.mxu2 %v2197_v48  ;;  %v2266_v48 = vld [vmem:[%s3056_s3 + $0x1a8] sm:$0xff] }
  0xb4   : > { %v358_v40 = vadd.f32 %v357_v37, %v250_v30  ;;  %v377_v42 = vadd.f32 %v376_v41, %v251_v32  ;;  %v2287_v45 = vpop.eup %2286 }
  0xb5   : > { %v2289_v46 = vpop.eup %2288 }
  0xb6   : > { %2290 = vtanh.f32 %v358_v40 }
  0xb7   : > { %2292 = vtanh.f32 %v377_v42 }
  0xbb   : > { %v360_v47 = vpop.f32.mrf.mxu0  ;;  %v379_v51 = vpop.f32.mrf.mxu1 }
  0xbc   : > { %v2291_v50 = vpop.eup %2290  ;;  %v361_v58 = vadd.f32 %v360_v47, %v250_v30  ;;  %v380_v59 = vadd.f32 %v379_v51, %v251_v32 }
  0xbd   : > { %v2293_v52 = vpop.eup %2292  ;;  %v392_v53 = vpack.c.bf16 %v2291_v50, %v2287_v45  ;;  %v916_v50 = vld [vmem:[%s3055_s2 + $0x4] sm:$0x3] }
  0xbe   : > { %v393_v54 = vpack.c.bf16 %v2293_v52, %v2289_v46  ;;  %2294 = vtanh.f32 %v361_v58  ;;  %v918_v58 = vperm.slane %v916_v50, 0 }
  0xbf   : > { %536 = vmatmul.bf16.vlgmr.msra.gmra.mxu2 %v392_v53  ;;  %2296 = vtanh.f32 %v380_v59 }
  0xc0   : > { %555 = vmatmul.bf16.vlgmr.msra.gmra.mxu3 %v393_v54  ;;  %1180 = vmatpush.bf16.msra.mxu2 %v2236_v55  ;;  %v2265_v54 = vld [vmem:[%s3056_s3 + $0x1a0] sm:$0xff] }
  0xc1   : > { %1199 = vmatpush.bf16.msra.mxu3 %v2244_v57  ;;  %v2273_v55 = vld [vmem:[%s3056_s3 + $0x1e0] sm:$0xff] }
  0xc3   : > { %v362_v60 = vpop.f32.mrf.mxu0  ;;  %v381_v0 = vpop.f32.mrf.mxu1 }
  0xc4   : > { %v363_v63 = vadd.f32 %v362_v60, %v250_v30  ;;  %v382_v1 = vadd.f32 %v381_v0, %v251_v32  ;;  %1181 = vmatpush.bf16.msra.mxu2 %v2235_v61  ;;  %v2295_v5 = vpop.eup %2294  ;;  %v2237_v32 = vld [vmem:[%s3056_s3 + $0x140] sm:$0xff]  ;;  %v919_v61 = vperm.slane %v916_v50, 1  ;;  %v2264_v0 = vld [vmem:[%s3056_s3 + $0x198] sm:$0xff] }
  0xc5   : > { %1200 = vmatpush.bf16.msra.mxu3 %v2243_v62  ;;  %v2297_v6 = vpop.eup %2296 }
  0xc6   : > { %2298 = vtanh.f32 %v363_v63 }
  0xc7   : > { %2300 = vtanh.f32 %v382_v1  ;;  %v2272_v1 = vld [vmem:[%s3056_s3 + $0x1d8] sm:$0xff] }
  0xc8   : > { %1182 = vmatpush.bf16.msra.mxu2 %v2234_v2 }
  0xc9   : > { %1201 = vmatpush.bf16.msra.mxu3 %v2242_v3 }
  0xcb   : > { %v681_v7 = vpop.f32.mrf.mxu0  ;;  %v700_v12 = vpop.f32.mrf.mxu1 }
  0xcc   : > { %v2299_v10 = vpop.eup %2298  ;;  %1183 = vmatpush.bf16.msra.mxu2 %v2233_v8  ;;  %v682_v19 = vadd.f32 %v681_v7, %v588_v11  ;;  %v701_v20 = vadd.f32 %v700_v12, %v589_v14 }
  0xcd   : > { %v2301_v13 = vpop.eup %2300  ;;  %v394_v15 = vpack.c.bf16 %v2299_v10, %v2295_v5  ;;  %1202 = vmatpush.bf16.msra.mxu3 %v2241_v9  ;;  %v2263_v5 = vld [vmem:[%s3056_s3 + $0x190] sm:$0xff]  ;;  %v2262_v10 = vld [vmem:[%s3056_s3 + $0x188] sm:$0xff] }
  0xce   : > { %v395_v16 = vpack.c.bf16 %v2301_v13, %v2297_v6  ;;  %2302 = vtanh.f32 %v682_v19  ;;  %v2271_v6 = vld [vmem:[%s3056_s3 + $0x1d0] sm:$0xff] }
  0xcf   : > { %541 = vmatmul.bf16.gmra.mxu2 %v394_v15  ;;  %2304 = vtanh.f32 %v701_v20  ;;  %v2261_v15 = vld [vmem:[%s3056_s3 + $0x180] sm:$0xff] }
  0xd0   : > { %560 = vmatmul.bf16.gmra.mxu3 %v395_v16  ;;  %1184 = vmatpush.bf16.msra.mxu2 %v2232_v56  ;;  %v2269_v16 = vld [vmem:[%s3056_s3 + $0x1c0] sm:$0xff] }
  0xd1   : > { %1203 = vmatpush.bf16.msra.mxu3 %v2240_v18 }
  0xd3   : > { %v683_v21 = vpop.f32.mrf.mxu0  ;;  %v702_v17 = vpop.f32.mrf.mxu1 }
  0xd4   : > { %v684_v24 = vadd.f32 %v683_v21, %v588_v11  ;;  %v703_v25 = vadd.f32 %v702_v17, %v589_v14  ;;  %1185 = vmatpush.bf16.msra.mxu2 %v2231_v22  ;;  %v2303_v28 = vpop.eup %2302 }
  0xd5   : > { %1204 = vmatpush.bf16.msra.mxu3 %v2239_v23  ;;  %v2305_v29 = vpop.eup %2304 }
  0xd6   : > { %2306 = vtanh.f32 %v684_v24 }
  0xd7   : > { %2308 = vtanh.f32 %v703_v25 }
  0xd8   : > { %1186 = vmatpush.bf16.msra.mxu2 %v2230_v26 }
  0xd9   : > { %1205 = vmatpush.bf16.msra.mxu3 %v2238_v27  ;;  %v1246_v27 = vld [vmem:[%s3055_s2 + $0x6] sm:$0x3] }
  0xdb   : > { %v686_v30 = vpop.f32.mrf.mxu0  ;;  %v705_v34 = vpop.f32.mrf.mxu1 }
  0xdc   : > { %v2307_v33 = vpop.eup %2306  ;;  %1187 = vmatpush.bf16.msra.mxu2 %v2229_v31  ;;  %v687_v40 = vadd.f32 %v686_v30, %v588_v11  ;;  %v706_v41 = vadd.f32 %v705_v34, %v589_v14 }
  0xdd   : > { %v2309_v35 = vpop.eup %2308  ;;  %v718_v36 = vpack.c.bf16 %v2307_v33, %v2303_v28  ;;  %1206 = vmatpush.bf16.msra.mxu3 %v2237_v32  ;;  %v1248_v32 = vperm.slane %v1246_v27, 0 }
  0xde   : > { %v719_v37 = vpack.c.bf16 %v2309_v35, %v2305_v29  ;;  %2310 = vtanh.f32 %v687_v40  ;;  %v1249_v35 = vperm.slane %v1246_v27, 1 }
  0xdf   : > { %858 = vmatmul.bf16.vlgmr.msrb.gmra.mxu2 %v718_v36  ;;  %2312 = vtanh.f32 %v706_v41 }
  0xe0   : > { %877 = vmatmul.bf16.vlgmr.msrb.gmra.mxu3 %v719_v37  ;;  %1510 = vmatpush.bf16.msrb.mxu2 %v2268_v38 }
  0xe1   : > { %1529 = vmatpush.bf16.msrb.mxu3 %v2276_v39 }
  0xe3   : > { %v688_v42 = vpop.f32.mrf.mxu0  ;;  %v707_v46 = vpop.f32.mrf.mxu1 }
  0xe4   : > { %v689_v45 = vadd.f32 %v688_v42, %v588_v11  ;;  %v708_v47 = vadd.f32 %v707_v46, %v589_v14  ;;  %1511 = vmatpush.bf16.msrb.mxu2 %v2267_v43  ;;  %v2311_v51 = vpop.eup %2310  ;;  %v2270_v11 = vld [vmem:[%s3056_s3 + $0x1c8] sm:$0xff] }
  0xe5   : > { %1530 = vmatpush.bf16.msrb.mxu3 %v2275_v44  ;;  %v2313_v52 = vpop.eup %2312 }
  0xe6   : > { %2314 = vtanh.f32 %v689_v45 }
  0xe7   : > { %2316 = vtanh.f32 %v708_v47 }
  0xe8   : > { %1512 = vmatpush.bf16.msrb.mxu2 %v2266_v48 }
  0xe9   : > { %1531 = vmatpush.bf16.msrb.mxu3 %v2274_v49 }
  0xeb   : > { %v1011_v53 = vpop.f32.mrf.mxu0  ;;  %v1030_v59 = vpop.f32.mrf.mxu1 }
  0xec   : > { %v2315_v57 = vpop.eup %2314  ;;  %1513 = vmatpush.bf16.msrb.mxu2 %v2265_v54  ;;  %v1012_v2 = vadd.f32 %v1011_v53, %v918_v58  ;;  %v1031_v3 = vadd.f32 %v1030_v59, %v919_v61 }
  0xed   : > { %v2317_v60 = vpop.eup %2316  ;;  %v720_v62 = vpack.c.bf16 %v2315_v57, %v2311_v51  ;;  %1532 = vmatpush.bf16.msrb.mxu3 %v2273_v55 }
  0xee   : > { %v721_v63 = vpack.c.bf16 %v2317_v60, %v2313_v52  ;;  %2318 = vtanh.f32 %v1012_v2 }
  0xef   : > { %863 = vmatmul.bf16.gmra.mxu2 %v720_v62  ;;  %2320 = vtanh.f32 %v1031_v3 }
  0xf0   : > { %882 = vmatmul.bf16.gmra.mxu3 %v721_v63  ;;  %1514 = vmatpush.bf16.msrb.mxu2 %v2264_v0 }
  0xf1   : > { %1533 = vmatpush.bf16.msrb.mxu3 %v2272_v1  ;;  %v2285_v1 = vld [vmem:[%s3057_s4] ss:$0 sm:$0xff] }
  0xf3   : > { %v1013_v4 = vpop.f32.mrf.mxu0  ;;  %v1032_v8 = vpop.f32.mrf.mxu1 }
  0xf4   : > { %v1014_v7 = vadd.f32 %v1013_v4, %v918_v58  ;;  %v1033_v9 = vadd.f32 %v1032_v8, %v919_v61  ;;  %1515 = vmatpush.bf16.msrb.mxu2 %v2263_v5  ;;  %v2319_v12 = vpop.eup %2318 }
  0xf5   : > { %1534 = vmatpush.bf16.msrb.mxu3 %v2271_v6  ;;  %v2321_v13 = vpop.eup %2320 }
  0xf6   : > { %2322 = vtanh.f32 %v1014_v7 }
  0xf7   : > { %2324 = vtanh.f32 %v1033_v9 }
  0xf8   : > { %1516 = vmatpush.bf16.msrb.mxu2 %v2262_v10 }
  0xf9   : > { %1535 = vmatpush.bf16.msrb.mxu3 %v2270_v11 }
  0xfb   : > { %v1016_v14 = vpop.f32.mrf.mxu0  ;;  %v1035_v18 = vpop.f32.mrf.mxu1 }
  0xfc   : > { %v2323_v56 = vpop.eup %2322  ;;  %1517 = vmatpush.bf16.msrb.mxu2 %v2261_v15  ;;  %v1017_v22 = vadd.f32 %v1016_v14, %v918_v58  ;;  %v1036_v23 = vadd.f32 %v1035_v18, %v919_v61 }
  0xfd   : > { %v2325_v19 = vpop.eup %2324  ;;  %v1048_v20 = vpack.c.bf16 %v2323_v56, %v2319_v12  ;;  %1536 = vmatpush.bf16.msrb.mxu3 %v2269_v16 }
  0xfe   : > { %v1049_v21 = vpack.c.bf16 %v2325_v19, %v2321_v13  ;;  %2326 = vtanh.f32 %v1017_v22 }
  0xff   : > { %1188 = vmatmul.bf16.vlgmr.msra.gmra.mxu2 %v1048_v20  ;;  %2328 = vtanh.f32 %v1036_v23 }
 0x100   : > { %1207 = vmatmul.bf16.vlgmr.msra.gmra.mxu3 %v1049_v21 }
 0x103   : > { %v1018_v24 = vpop.f32.mrf.mxu0  ;;  %v1037_v25 = vpop.f32.mrf.mxu1 }
 0x104   : > { %v1019_v17 = vadd.f32 %v1018_v24, %v918_v58  ;;  %v1038_v26 = vadd.f32 %v1037_v25, %v919_v61  ;;  %v2327_v28 = vpop.eup %2326 }
 0x105   : > { %v2329_v29 = vpop.eup %2328 }
 0x106   : > { %2330 = vtanh.f32 %v1019_v17 }
 0x107   : > { %2332 = vtanh.f32 %v1038_v26 }
 0x10b   : > { %v1341_v30 = vpop.f32.mrf.mxu0  ;;  %v1360_v33 = vpop.f32.mrf.mxu1 }
 0x10c   : > { %v2331_v31 = vpop.eup %2330  ;;  %v1342_v38 = vadd.f32 %v1341_v30, %v1248_v32  ;;  %v1361_v39 = vadd.f32 %v1360_v33, %v1249_v35 }
 0x10d   : > { %v2333_v34 = vpop.eup %2332  ;;  %v1050_v36 = vpack.c.bf16 %v2331_v31, %v2327_v28 }
 0x10e   : > { %v1051_v37 = vpack.c.bf16 %v2333_v34, %v2329_v29  ;;  %2334 = vtanh.f32 %v1342_v38 }
 0x10f   : > { %1193 = vmatmul.bf16.gmra.mxu2 %v1050_v36  ;;  %2336 = vtanh.f32 %v1361_v39 }
 0x110   : > { %1212 = vmatmul.bf16.gmra.mxu3 %v1051_v37 }
 0x113   : > { %v1343_v40 = vpop.f32.mrf.mxu0  ;;  %v1362_v42 = vpop.f32.mrf.mxu1 }
 0x114   : > { %v1344_v41 = vadd.f32 %v1343_v40, %v1248_v32  ;;  %v1363_v43 = vadd.f32 %v1362_v42, %v1249_v35  ;;  %v2335_v44 = vpop.eup %2334 }
 0x115   : > { %v2337_v45 = vpop.eup %2336 }
 0x116   : > { %2338 = vtanh.f32 %v1344_v41 }
 0x117   : > { %2340 = vtanh.f32 %v1363_v43 }
 0x11b   : > { %v1346_v46 = vpop.f32.mrf.mxu0  ;;  %v1365_v48 = vpop.f32.mrf.mxu1 }
 0x11c   : > { %v2339_v47 = vpop.eup %2338  ;;  %v1347_v52 = vadd.f32 %v1346_v46, %v1248_v32  ;;  %v1366_v53 = vadd.f32 %v1365_v48, %v1249_v35 }
 0x11d   : > { %v2341_v49 = vpop.eup %2340  ;;  %v1378_v50 = vpack.c.bf16 %v2339_v47, %v2335_v44 }
 0x11e   : > { %v1379_v51 = vpack.c.bf16 %v2341_v49, %v2337_v45  ;;  %2342 = vtanh.f32 %v1347_v52 }
 0x11f   : > { %1518 = vmatmul.bf16.vlgmr.msrb.gmra.mxu2 %v1378_v50  ;;  %2344 = vtanh.f32 %v1366_v53 }
 0x120   : > { %1537 = vmatmul.bf16.vlgmr.msrb.gmra.mxu3 %v1379_v51 }
 0x123   : > { %v1348_v54 = vpop.f32.mrf.mxu0  ;;  %v1367_v57 = vpop.f32.mrf.mxu1 }
 0x124   : > { %v1349_v55 = vadd.f32 %v1348_v54, %v1248_v32  ;;  %v1368_v58 = vadd.f32 %v1367_v57, %v1249_v35  ;;  %v2343_v59 = vpop.eup %2342 }
 0x125   : > { %v2345_v60 = vpop.eup %2344 }
 0x126   : > { %2346 = vtanh.f32 %v1349_v55 }
 0x127   : > { %2348 = vtanh.f32 %v1368_v58 }
 0x12c   : > { %v2347_v61 = vpop.eup %2346 }
 0x12d   : > { %v2349_v62 = vpop.eup %2348  ;;  %v1380_v63 = vpack.c.bf16 %v2347_v61, %v2343_v59 }
 0x12e   : > { %v1381_v0 = vpack.c.bf16 %v2349_v62, %v2345_v60 }
 0x12f   : > { %1523 = vmatmul.bf16.gmra.mxu2 %v1380_v63 }
 0x130   : > { %1542 = vmatmul.bf16.gmra.mxu3 %v1381_v0 }
 0x142   : > { %v537_v2 = vpop.f32.mrf.mxu2 }
 0x143   : > { %v538_v3 = vadd.f32 %v2285_v1, %v537_v2  ;;  %v556_v4 = vpop.f32.mrf.mxu3 }
 0x145   : > { %v557_v5 = vadd.f32 %v556_v4, %v538_v3 }
 0x147   : > { %566 = vst [vmem:[%s3023_s6] sm:$0xff] %v557_v5 }
 0x14a   : > { %v539_v6 = vpop.f32.mrf.mxu2 }
 0x14b   : > { %v540_v7 = vadd.f32 %v2285_v1, %v539_v6  ;;  %v558_v8 = vpop.f32.mrf.mxu3 }
 0x14d   : > { %v559_v9 = vadd.f32 %v558_v8, %v540_v7 }
 0x14e   : > { %v888_v21 = vld [vmem:[%s3023_s6] sm:$0xff] }
 0x14f   : > { %567 = vst [vmem:[%s3023_s6 + $0x8] sm:$0xff] %v559_v9 }
 0x152   : > { %v542_v10 = vpop.f32.mrf.mxu2 }
 0x153   : > { %v543_v11 = vadd.f32 %v2285_v1, %v542_v10  ;;  %v561_v12 = vpop.f32.mrf.mxu3 }
 0x155   : > { %v562_v13 = vadd.f32 %v561_v12, %v543_v11 }
 0x156   : > { %v889_v23 = vld [vmem:[%s3023_s6 + $0x8] sm:$0xff] }
 0x157   : > { %568 = vst [vmem:[%s3023_s6 + $0x10] sm:$0xff] %v562_v13 }
 0x15a   : > { %v544_v14 = vpop.f32.mrf.mxu2 }
 0x15b   : > { %v545_v15 = vadd.f32 %v2285_v1, %v544_v14  ;;  %v563_v16 = vpop.f32.mrf.mxu3 }
 0x15d   : > { %v564_v56 = vadd.f32 %v563_v16, %v545_v15 }
 0x15e   : > { %v890_v24 = vld [vmem:[%s3023_s6 + $0x10] sm:$0xff] }
 0x15f   : > { %569 = vst [vmem:[%s3023_s6 + $0x18] sm:$0xff] %v564_v56 }
 0x162   : > { %v859_v18 = vpop.f32.mrf.mxu2 }
 0x163   : > { %v878_v19 = vpop.f32.mrf.mxu3 }
 0x164   : > { %v879_v20 = vadd.f32 %v878_v19, %v859_v18 }
 0x166   : > { %v892_v22 = vadd.f32 %v888_v21, %v879_v20 }
 0x168   : > { %896 = vst [vmem:[%s3023_s6] sm:$0xff] %v892_v22 }
 0x16a   : > { %v861_v17 = vpop.f32.mrf.mxu2 }
 0x16b   : > { %v880_v25 = vpop.f32.mrf.mxu3 }
 0x16c   : > { %v881_v26 = vadd.f32 %v880_v25, %v861_v17 }
 0x16e   : > { %v893_v27 = vadd.f32 %v889_v23, %v881_v26 }
 0x16f   : > { %v1218_v39 = vld [vmem:[%s3023_s6] sm:$0xff] }
 0x170   : > { %897 = vst [vmem:[%s3023_s6 + $0x8] sm:$0xff] %v893_v27 }
 0x172   : > { %v864_v28 = vpop.f32.mrf.mxu2 }
 0x173   : > { %v883_v29 = vpop.f32.mrf.mxu3 }
 0x174   : > { %v884_v30 = vadd.f32 %v883_v29, %v864_v28 }
 0x176   : > { %v894_v31 = vadd.f32 %v890_v24, %v884_v30 }
 0x177   : > { %v1219_v41 = vld [vmem:[%s3023_s6 + $0x8] sm:$0xff] }
 0x178   : > { %898 = vst [vmem:[%s3023_s6 + $0x10] sm:$0xff] %v894_v31 }
 0x17a   : > { %v866_v32 = vpop.f32.mrf.mxu2 }
 0x17b   : > { %v885_v33 = vpop.f32.mrf.mxu3 }
 0x17c   : > { %v886_v34 = vadd.f32 %v885_v33, %v866_v32 }
 0x17e   : > { %v895_v35 = vadd.f32 %v886_v34, %v564_v56 }
 0x17f   : > { %v1220_v42 = vld [vmem:[%s3023_s6 + $0x10] sm:$0xff] }
 0x180   : > { %899 = vst [vmem:[%s3023_s6 + $0x18] sm:$0xff] %v895_v35 }
 0x182   : > { %v1189_v36 = vpop.f32.mrf.mxu2 }
 0x183   : > { %v1208_v37 = vpop.f32.mrf.mxu3 }
 0x184   : > { %v1209_v38 = vadd.f32 %v1208_v37, %v1189_v36 }
 0x186   : > { %v1222_v40 = vadd.f32 %v1218_v39, %v1209_v38 }
 0x188   : > { %1226 = vst [vmem:[%s3023_s6] sm:$0xff] %v1222_v40 }
 0x18a   : > { %v1191_v43 = vpop.f32.mrf.mxu2 }
 0x18b   : > { %v1210_v44 = vpop.f32.mrf.mxu3 }
 0x18c   : > { %v1211_v45 = vadd.f32 %v1210_v44, %v1191_v43 }
 0x18e   : > { %v1223_v46 = vadd.f32 %v1219_v41, %v1211_v45 }
 0x18f   : > { %v1548_v59 = vld [vmem:[%s3023_s6] sm:$0xff] }
 0x190   : > { %1227 = vst [vmem:[%s3023_s6 + $0x8] sm:$0xff] %v1223_v46 }
 0x192   : > { %v1194_v47 = vpop.f32.mrf.mxu2 }
 0x193   : > { %v1213_v48 = vpop.f32.mrf.mxu3 }
 0x194   : > { %v1214_v49 = vadd.f32 %v1213_v48, %v1194_v47 }
 0x196   : > { %v1224_v50 = vadd.f32 %v1220_v42, %v1214_v49 }
 0x197   : > { %v1549_v61 = vld [vmem:[%s3023_s6 + $0x8] sm:$0xff] }
 0x198   : > { %1228 = vst [vmem:[%s3023_s6 + $0x10] sm:$0xff] %v1224_v50 }
 0x19a   : > { %v1196_v51 = vpop.f32.mrf.mxu2 }
 0x19b   : > { %v1215_v52 = vpop.f32.mrf.mxu3 }
 0x19c   : > { %v1216_v53 = vadd.f32 %v1215_v52, %v1196_v51 }
 0x19e   : > { %v1225_v54 = vadd.f32 %v1216_v53, %v895_v35 }
 0x19f   : > { %v1550_v62 = vld [vmem:[%s3023_s6 + $0x10] sm:$0xff] }
 0x1a0   : > { %1229 = vst [vmem:[%s3023_s6 + $0x18] sm:$0xff] %v1225_v54 }
 0x1a2   : > { %v1519_v55 = vpop.f32.mrf.mxu2 }
 0x1a3   : > { %v1538_v57 = vpop.f32.mrf.mxu3 }
 0x1a4   : > { %v1539_v58 = vadd.f32 %v1538_v57, %v1519_v55 }
 0x1a6   : > { %v1552_v60 = vadd.f32 %v1548_v59, %v1539_v58 }
 0x1a8   : > { %1556 = vst [vmem:[%s3023_s6] sm:$0xff] %v1552_v60 }
 0x1aa   : > { %v1521_v63 = vpop.f32.mrf.mxu2 }
 0x1ab   : > { %v1540_v0 = vpop.f32.mrf.mxu3 }
 0x1ac   : > { %v1541_v1 = vadd.f32 %v1540_v0, %v1521_v63 }
 0x1ae   : > { %v1553_v2 = vadd.f32 %v1549_v61, %v1541_v1 }
 0x1b0   : > { %1557 = vst [vmem:[%s3023_s6 + $0x8] sm:$0xff] %v1553_v2 }
 0x1b2   : > { %v1524_v3 = vpop.f32.mrf.mxu2 }
 0x1b3   : > { %v1543_v4 = vpop.f32.mrf.mxu3 }
 0x1b4   : > { %v1544_v5 = vadd.f32 %v1543_v4, %v1524_v3 }
 0x1b6   : > { %v1554_v6 = vadd.f32 %v1550_v62, %v1544_v5 }
 0x1b8   : > { %1558 = vst [vmem:[%s3023_s6 + $0x10] sm:$0xff] %v1554_v6 }
 0x1ba   : > { %v1526_v7 = vpop.f32.mrf.mxu2 }
 0x1bb   : > { %v1545_v8 = vpop.f32.mrf.mxu3 }
 0x1bc   : > { %v1546_v9 = vadd.f32 %v1545_v8, %v1526_v7 }
 0x1be   : > { %v1555_v10 = vadd.f32 %v1546_v9, %v1225_v54 }
 0x1c0   : > { %1559 = vst [vmem:[%s3023_s6 + $0x18] sm:$0xff] %v1555_v10 }
 0x1c1 PF: > { %s15_s18 = sadd.s32 1, %s2356_s18  }
 0x1c2   : > { %p12_p4 = scmp.ge.s32.totalorder %s15_s18, 4  }
 0x1c4   :  { %14 = sbr.rel (!%p12_p4) target bundleno = 1 (0x1), region = 70 }

</bundles_post_ra>
